<compile_context>
chip_gen: v7x
topology: tpu7x:2x2x1
jax: 0.10.0
libtpu: 0.0.40
codegen_flags: <defaults>
</compile_context>

<pallas_src>
import functools

import jax
import jax.numpy as jnp
from jax.experimental import pallas as pl
from jax.experimental.pallas import tpu as pltpu


def _cdiv(a, b):
    return -(-a // b)


def _round_up(n, m):
    return _cdiv(n, m) * m


def _vmem_capacity_bytes():
    """Physical VMEM per TensorCore; conservative fallback if query fails."""
    try:
        return int(pltpu.get_tpu_info().vmem_capacity_bytes)
    except Exception:
        return 64 * 1024 * 1024  # v7x per-TC capacity (safe everywhere)


# --------------------------------------------------------------------------
# Kernel
# --------------------------------------------------------------------------
def _sparse_memory_kernel(x_ref, w_enc_ref, b_enc_ref, w_dec_ref, b_dec_ref,
                          dec_ref, enc_ref):
    # x_ref:     (TB, E_pad)    bf16   (batch-tiled, auto double-buffered)
    # w_enc_ref: (E_pad, C_pad) bf16   (VMEM-resident, single copy)
    # b_enc_ref: (1, C_pad)     f32
    # w_dec_ref: (C_pad, E_pad) bf16
    # b_dec_ref: (1, E_pad)     f32
    x = x_ref[...]

    # Encoder: Linear + ReLU (bf16 MXU, f32 accumulate, f32 elementwise).
    pre_enc = jnp.dot(x, w_enc_ref[...], preferred_element_type=jnp.float32)
    encoded = jnp.maximum(pre_enc + b_enc_ref[...], 0.0)          # (TB, C_pad) f32

    # Decoder: Linear + Sigmoid.
    pre_dec = jnp.dot(encoded.astype(jnp.bfloat16), w_dec_ref[...],
                      preferred_element_type=jnp.float32)
    pre_dec = pre_dec + b_dec_ref[...]                            # (TB, E_pad) f32
    # sigmoid(x) = 1 / (1 + exp(-x)); exp + approx reciprocal both land on the
    # EUP slot, leaving VALU free for the bias adds / stores.
    decoded = pl.reciprocal(1.0 + jnp.exp(-pre_dec), approx=True)

    enc_ref[...] = encoded.astype(enc_ref.dtype)
    dec_ref[...] = decoded.astype(dec_ref.dtype)


# --------------------------------------------------------------------------
# One-time parameter preparation (hoisted out of the per-call forward)
# --------------------------------------------------------------------------
def prepare_params(w_enc, b_enc, w_dec, b_dec, *, lane_align=128):
    """Pad feature dims to lane multiples and cast weights to bf16 ONCE.

    Zero padding keeps results exact: padded encoder columns + zero bias pad
    give relu(0)=0 lanes that contribute nothing to the decoder; padded
    decoder output lanes are sliced off by the wrapper.
    """
    E, C = w_enc.shape
    assert w_dec.shape == (C, E)
    E_pad = _round_up(E, lane_align)
    C_pad = _round_up(C, lane_align)

    def pad2(x, shape):
        if x.shape == shape:
            return x
        return jnp.pad(x, [(0, t - s) for s, t in zip(x.shape, shape)])

    w_enc_p = pad2(w_enc.astype(jnp.bfloat16), (E_pad, C_pad))
    w_dec_p = pad2(w_dec.astype(jnp.bfloat16), (C_pad, E_pad))
    b_enc_p = pad2(b_enc.astype(jnp.float32).reshape(1, C), (1, C_pad))
    b_dec_p = pad2(b_dec.astype(jnp.float32).reshape(1, E), (1, E_pad))
    return w_enc_p, b_enc_p, w_dec_p, b_dec_p


# --------------------------------------------------------------------------
# Forward wrapper
# --------------------------------------------------------------------------
def sparse_memory_forward(event, w_enc_p, b_enc_p, w_dec_p, b_dec_p, *,
                          event_size, compressed_size,
                          max_batch_tile=512, out_dtype=jnp.bfloat16):
    """Returns (decoded, encoded), matching the PyTorch forward.

    Params must come from prepare_params() (padded + bf16, done once).
    """
    B, E = event.shape
    assert E == event_size
    E_pad, C_pad = w_enc_p.shape
    out_isz = jnp.dtype(out_dtype).itemsize

    # ---- Generation-aware batch tile: largest TB whose working set fits VMEM.
    vmem_cap = _vmem_capacity_bytes()
    budget = (vmem_cap * 3) // 4                              # headroom under physical
    weight_bytes = 2 * (E_pad * C_pad + C_pad * E_pad) + 4 * (E_pad + C_pad)
    # Streamed tiles (double-buffered): bf16 x + decoded + encoded.
    stream_row = 2 * (2 * E_pad) + 2 * (out_isz * E_pad) + 2 * (out_isz * C_pad)
    # In-kernel f32 temporaries (encoded, decoder pre-activation) + slack.
    temp_row = 4 * C_pad + 4 * E_pad + 2 * E_pad
    row_bytes = stream_row + temp_row

    B8 = _round_up(B, 8)
    tb_cap = max(8, (budget - weight_bytes) // row_bytes)
    tb_cap = max(8, (min(max_batch_tile, tb_cap, B8) // 8) * 8)
    num_tiles = _cdiv(B8, tb_cap)
    if num_tiles == 1 and B8 >= 16:
        num_tiles = 2                      # give both v7x TensorCores work
    TB = _round_up(_cdiv(B8, num_tiles), 8)  # even split -> minimal over-padding
    num_tiles = _cdiv(B8, TB)
    B_pad = TB * num_tiles

    working_set = weight_bytes + TB * row_bytes
    vmem_limit = int(min(vmem_cap - (2 << 20),
                         max(working_set + (16 << 20), 32 << 20)))

    # ---- x: bf16 (halves the dominant streamed bytes); pad only if needed.
    x = event if event.dtype == jnp.bfloat16 else event.astype(jnp.bfloat16)
    if x.shape != (B_pad, E_pad):
        x = jnp.pad(x, ((0, B_pad - B), (0, E_pad - E)))

    # Advisory cost estimate for XLA's scheduler.
    flops = 4 * B_pad * E_pad * C_pad
    transcendentals = B_pad * E_pad
    bytes_accessed = (B_pad * E_pad * 2 + weight_bytes
                      + B_pad * E_pad * out_isz + B_pad * C_pad * out_isz)

    # Weights/biases: whole-array VMEM residency (single copy, no re-DMA,
    # no double-buffer) -- the feedback's "single-buffered resident weights".
    resident = pl.BlockSpec(memory_space=pltpu.MemorySpace.VMEM)

    decoded_p, encoded_p = pl.pallas_call(
        _sparse_memory_kernel,
        out_shape=(
            jax.ShapeDtypeStruct((B_pad, E_pad), out_dtype),   # decoded
            jax.ShapeDtypeStruct((B_pad, C_pad), out_dtype),   # encoded
        ),
        grid=(num_tiles,),
        in_specs=[
            pl.BlockSpec((TB, E_pad), lambda i: (i, 0)),       # x: batch-tiled
            resident,                                          # W_enc
            resident,                                          # b_enc
            resident,                                          # W_dec
            resident,                                          # b_dec
        ],
        out_specs=(
            pl.BlockSpec((TB, E_pad), lambda i: (i, 0)),
            pl.BlockSpec((TB, C_pad), lambda i: (i, 0)),
        ),
        compiler_params=pltpu.CompilerParams(
            dimension_semantics=("parallel",),    # shards batch across v7x's 2 TCs
            vmem_limit_bytes=vmem_limit,
        ),
        cost_estimate=pl.CostEstimate(
            flops=flops,
            transcendentals=transcendentals,
            bytes_accessed=bytes_accessed,
        ),
    )(x, w_enc_p, b_enc_p, w_dec_p, b_dec_p)

    # Slice away the zero-padded lanes / rows.
    return decoded_p[:B, :event_size], encoded_p[:B, :compressed_size]


def init_params(key, event_size, compressed_size, dtype=jnp.float32):
    """Deterministic init mimicking nn.Linear's uniform(-1/sqrt(fan_in), ...)."""
    k1, k2, k3, k4 = jax.random.split(key, 4)
    lim_e = 1.0 / (event_size ** 0.5)
    lim_c = 1.0 / (compressed_size ** 0.5)
    # Stored as (in, out) — transposed relative to PyTorch's (out, in).
    w_enc = jax.random.uniform(k1, (event_size, compressed_size), dtype, -lim_e, lim_e)
    b_enc = jax.random.uniform(k2, (compressed_size,), dtype, -lim_e, lim_e)
    w_dec = jax.random.uniform(k3, (compressed_size, event_size), dtype, -lim_c, lim_c)
    b_dec = jax.random.uniform(k4, (event_size,), dtype, -lim_c, lim_c)
    return w_enc, b_enc, w_dec, b_dec


if __name__ == "__main__":
    key = jax.random.PRNGKey(0)
    batch, event_size, compressed_size = 8, 32, 16

    k_x, k_p = jax.random.split(key)
    event = jax.random.normal(k_x, (batch, event_size), jnp.float32)
    w_enc, b_enc, w_dec, b_dec = init_params(k_p, event_size, compressed_size)

    # Pad + cast the weights exactly once (hoisted out of the per-call path).
    prepared = prepare_params(w_enc, b_enc, w_dec, b_dec)

    fwd = jax.jit(functools.partial(
        sparse_memory_forward,
        event_size=event_size,
        compressed_size=compressed_size))

    decoded, encoded = fwd(event, *prepared)
    jax.block_until_ready((decoded, encoded))

    # Pure-JAX f32 reference (tolerance loosened for bf16 matmul inputs,
    # bf16 outputs, and the approx EUP reciprocal inside the sigmoid).
    enc_ref = jnp.maximum(event @ w_enc + b_enc, 0.0)
    dec_ref = jax.nn.sigmoid(enc_ref @ w_dec + b_dec)
    assert decoded.shape == (batch, event_size)
    assert encoded.shape == (batch, compressed_size)
    assert jnp.allclose(encoded.astype(jnp.float32), enc_ref, atol=3e-2, rtol=3e-2)
    assert jnp.allclose(decoded.astype(jnp.float32), dec_ref, atol=3e-2, rtol=3e-2)

    print("KERNEL_OK")
</pallas_src>

<mosaic_0001>
module attributes {stable_mosaic.version = 11 : i64} {
  func.func @_sparse_memory_kernel(%arg0: i32, %arg1: memref<8x128xbf16, #tpu.memory_space<vmem>>, %arg2: memref<128x128xbf16, #tpu.memory_space<vmem>>, %arg3: memref<1x128xf32, #tpu.memory_space<vmem>>, %arg4: memref<128x128xbf16, #tpu.memory_space<vmem>>, %arg5: memref<1x128xf32, #tpu.memory_space<vmem>>, %arg6: memref<8x128xbf16, #tpu.memory_space<vmem>>, %arg7: memref<8x128xbf16, #tpu.memory_space<vmem>>) attributes {dimension_semantics = [#tpu.dimension_semantics<parallel>], iteration_bounds = array<i64: 1>, scalar_prefetch = 0 : i64, scratch_operands = 0 : i64, tpu.core_type = #tpu.core_type<tc>, window_params = [{transform_indices = @transform_0, window_bounds = array<i64: 8, 128>}, {pipeline_mode = #tpu.pipeline_mode<synchronous>, transform_indices = @transform_1, window_bounds = array<i64: 128, 128>}, {pipeline_mode = #tpu.pipeline_mode<synchronous>, transform_indices = @transform_2, window_bounds = array<i64: 1, 128>}, {pipeline_mode = #tpu.pipeline_mode<synchronous>, transform_indices = @transform_3, window_bounds = array<i64: 128, 128>}, {pipeline_mode = #tpu.pipeline_mode<synchronous>, transform_indices = @transform_4, window_bounds = array<i64: 1, 128>}, {transform_indices = @transform_5, window_bounds = array<i64: 8, 128>}, {transform_indices = @transform_6, window_bounds = array<i64: 8, 128>}]} {
    %c0 = arith.constant 0 : index
    %c0_0 = arith.constant 0 : index
    %0 = vector.load %arg1[%c0, %c0_0] : memref<8x128xbf16, #tpu.memory_space<vmem>>, vector<8x128xbf16>
    %c0_1 = arith.constant 0 : index
    %c0_2 = arith.constant 0 : index
    %1 = vector.load %arg2[%c0_1, %c0_2] : memref<128x128xbf16, #tpu.memory_space<vmem>>, vector<128x128xbf16>
    %cst = arith.constant dense<0.000000e+00> : vector<8x128xf32>
    %2 = tpu.matmul %0, %1, %cst {dimension_numbers = #tpu.dot_dimension_numbers<[1], [0], [0], [1], [0, 0, 1, 1], [], []>} : vector<8x128xbf16>, vector<128x128xbf16>, vector<8x128xf32> -> vector<8x128xf32>
    %c0_3 = arith.constant 0 : index
    %c0_4 = arith.constant 0 : index
    %3 = vector.load %arg3[%c0_3, %c0_4] : memref<1x128xf32, #tpu.memory_space<vmem>>, vector<1x128xf32>
    %4 = vector.broadcast %3 : vector<1x128xf32> to vector<8x128xf32>
    %5 = arith.addf %2, %4 : vector<8x128xf32>
    %cst_5 = arith.constant 0.000000e+00 : f32
    %6 = vector.broadcast %cst_5 : f32 to vector<8x128xf32>
    %7 = arith.maximumf %5, %6 : vector<8x128xf32>
    %8 = arith.truncf %7 : vector<8x128xf32> to vector<8x128xbf16>
    %c0_6 = arith.constant 0 : index
    %c0_7 = arith.constant 0 : index
    %9 = vector.load %arg4[%c0_6, %c0_7] : memref<128x128xbf16, #tpu.memory_space<vmem>>, vector<128x128xbf16>
    %cst_8 = arith.constant dense<0.000000e+00> : vector<8x128xf32>
    %10 = tpu.matmul %8, %9, %cst_8 {dimension_numbers = #tpu.dot_dimension_numbers<[1], [0], [0], [1], [0, 0, 1, 1], [], []>} : vector<8x128xbf16>, vector<128x128xbf16>, vector<8x128xf32> -> vector<8x128xf32>
    %c0_9 = arith.constant 0 : index
    %c0_10 = arith.constant 0 : index
    %11 = vector.load %arg5[%c0_9, %c0_10] : memref<1x128xf32, #tpu.memory_space<vmem>>, vector<1x128xf32>
    %12 = vector.broadcast %11 : vector<1x128xf32> to vector<8x128xf32>
    %13 = arith.addf %10, %12 : vector<8x128xf32>
    %cst_11 = arith.constant 0.000000e+00 : f32
    %14 = vector.broadcast %cst_11 : f32 to vector<8x128xf32>
    %15 = arith.subf %14, %13 : vector<8x128xf32>
    %16 = math.exp %15 : vector<8x128xf32>
    %cst_12 = arith.constant 1.000000e+00 : f32
    %17 = vector.broadcast %cst_12 : f32 to vector<8x128xf32>
    %18 = arith.addf %17, %16 : vector<8x128xf32>
    %19 = tpu.reciprocal %18 {approx = true} : vector<8x128xf32> -> vector<8x128xf32>
    %20 = arith.truncf %7 : vector<8x128xf32> to vector<8x128xbf16>
    %c0_13 = arith.constant 0 : index
    %c0_14 = arith.constant 0 : index
    %21 = vector.load %arg7[%c0_13, %c0_14] : memref<8x128xbf16, #tpu.memory_space<vmem>>, vector<8x128xbf16>
    tpu.vector_store %arg7[%c0_13, %c0_14], %20 {strides = array<i32>} : memref<8x128xbf16, #tpu.memory_space<vmem>>, vector<8x128xbf16>,
    %22 = arith.truncf %19 : vector<8x128xf32> to vector<8x128xbf16>
    %c0_15 = arith.constant 0 : index
    %c0_16 = arith.constant 0 : index
    %23 = vector.load %arg6[%c0_15, %c0_16] : memref<8x128xbf16, #tpu.memory_space<vmem>>, vector<8x128xbf16>
    tpu.vector_store %arg6[%c0_15, %c0_16], %22 {strides = array<i32>} : memref<8x128xbf16, #tpu.memory_space<vmem>>, vector<8x128xbf16>,
    return
  }
  func.func @transform_0(%arg0: i32) -> (i32, i32) {
    %c0_i32 = arith.constant 0 : i32
    %c0_i32_0 = arith.constant 0 : i32
    return %arg0, %c0_i32 : i32, i32
  }
  func.func @transform_1(%arg0: i32) -> (i32, i32) {
    %c0_i32 = arith.constant 0 : i32
    %c0_i32_0 = arith.constant 0 : i32
    %c0_i32_1 = arith.constant 0 : i32
    return %c0_i32, %c0_i32_0 : i32, i32
  }
  func.func @transform_2(%arg0: i32) -> (i32, i32) {
    %c0_i32 = arith.constant 0 : i32
    %c0_i32_0 = arith.constant 0 : i32
    %c0_i32_1 = arith.constant 0 : i32
    return %c0_i32, %c0_i32_0 : i32, i32
  }
  func.func @transform_3(%arg0: i32) -> (i32, i32) {
    %c0_i32 = arith.constant 0 : i32
    %c0_i32_0 = arith.constant 0 : i32
    %c0_i32_1 = arith.constant 0 : i32
    return %c0_i32, %c0_i32_0 : i32, i32
  }
  func.func @transform_4(%arg0: i32) -> (i32, i32) {
    %c0_i32 = arith.constant 0 : i32
    %c0_i32_0 = arith.constant 0 : i32
    %c0_i32_1 = arith.constant 0 : i32
    return %c0_i32, %c0_i32_0 : i32, i32
  }
  func.func @transform_5(%arg0: i32) -> (i32, i32) {
    %c0_i32 = arith.constant 0 : i32
    %c0_i32_0 = arith.constant 0 : i32
    return %arg0, %c0_i32 : i32, i32
  }
  func.func @transform_6(%arg0: i32) -> (i32, i32) {
    %c0_i32 = arith.constant 0 : i32
    %c0_i32_0 = arith.constant 0 : i32
    return %arg0, %c0_i32 : i32, i32
  }
}

</mosaic_0001>

<bundles_post_ra>
// kernel: sparse_memory_forward.1
= control target key start
LH: loop header
LB: loop body
LE: loop exit
PB: predicated region body
PF: predicated region fallthrough
CT: control target
= control target key end

     0   :  { %12 = vsyncpa [#allocation3], 0  ;;  %s616_s0 = inlined_call_operand.vmem [shape: bf16[8,128], index: 0, kind: input, shape index: {}]   ;;  %s617_s1 = inlined_call_operand.hbm [shape: bf16[128,128], index: 1, kind: input, shape index: {}]   ;;  %s618_s2 = inlined_call_operand.vmem [shape: f32[1,128], index: 2, kind: input, shape index: {}]   ;;  %s619_s3 = inlined_call_operand.hbm [shape: bf16[128,128], index: 3, kind: input, shape index: {}]   ;;  %s620_s4 = inlined_call_operand.vmem [shape: f32[1,128], index: 4, kind: input, shape index: {}]   ;;  %s621_s5 = inlined_call_operand.hbm [shape: bf16[8,128], index: 5, kind: output, shape index: {0}]   ;;  %s622_s6 = inlined_call_operand.hbm [shape: bf16[8,128], index: 6, kind: output, shape index: {1}]  }
   0x1   :  { %13 = vsyncpa [#allocation6], 0 }
   0x2   :  { %14 = vsyncpa [#allocation4], 0 }
   0x3   :  { %15 = vsyncpa [#allocation9], 0  ;;  %s516_s21 = smov [#allocation2]   ;;  %s420_s25 = scalar_lea.hbm %s617_s1, 1024 }
   0x4   :  { %s23_s22 = sshll.u32 %s516_s21, 4  ;;  %p421_p0 = scmp.ne.s32.totalorder %s617_s1, %s420_s25  ;;  %s24_s22 = int_to_ptr.vmem [resolvable:$true] %s23_s22 }
   0x5   :  { %p424_p1 = scmp.lt.u32.totalorder %s420_s25, %s617_s1 }
   0x7   :  { %p426_p2 = pnand %p424_p1, %p421_p0 }
   0x9   :  { %429 = shalt.err (!%p426_p2)
}
   0xa   :  { %s430_s30 = scalar_lea.vmem %s24_s22, 1024  ;;  %p435_p4 = scmp.lt.s32.totalorder %s24_s22, %s24_s22 }
   0xb   :  { %p431_p3 = scmp.ne.s32.totalorder %s24_s22, %s430_s30  ;;  %p436_p5 = scmp.lt.s32.totalorder %s430_s30, %s430_s30 }
   0xd   :  { %p437_p6 = por %p436_p5, %p435_p4 }
   0xf   :  { %p438_p7 = pnand %p437_p6, %p431_p3 }
  0x11   :  { %441 = shalt.err (!%p438_p7)
}
  0x12   :  { %s517_s7 = smov 64   ;;  %s518_s8 = smov 4  }
  0x13   :  { %29 = dma.hbm_to_vmem [thread:$0]  %s617_s1, 1024, %s24_s22, [#allocation3], %s517_s7, %s517_s7, %s518_s8  }
  0x14   :  { %s519_s11 = smov [#allocation5]   ;;  %s442_s15 = scalar_lea.hbm %s619_s3, 1024 }
  0x15   :  { %s37_s12 = sshll.u32 %s519_s11, 4  ;;  %p443_p8 = scmp.ne.s32.totalorder %s619_s3, %s442_s15  ;;  %s38_s12 = int_to_ptr.vmem [resolvable:$true] %s37_s12 }
  0x16   :  { %p446_p9 = scmp.lt.u32.totalorder %s442_s15, %s619_s3 }
  0x18   :  { %p448_p10 = pnand %p446_p9, %p443_p8 }
  0x1a   :  { %451 = shalt.err (!%p448_p10)
}
  0x1b   :  { %s452_s20 = scalar_lea.vmem %s38_s12, 1024  ;;  %p457_p12 = scmp.lt.s32.totalorder %s38_s12, %s38_s12 }
  0x1c   :  { %p453_p11 = scmp.ne.s32.totalorder %s38_s12, %s452_s20  ;;  %p458_p13 = scmp.lt.s32.totalorder %s452_s20, %s452_s20 }
  0x1e   :  { %p459_p0 = por %p458_p13, %p457_p12 }
  0x20   :  { %p460_p1 = pnand %p459_p0, %p453_p11 }
  0x22   :  { %463 = shalt.err (!%p460_p1)
}
  0x23   :  { %43 = dma.hbm_to_vmem [thread:$0]  %s619_s3, 1024, %s38_s12, [#allocation6], %s517_s7, %s517_s7, %s518_s8  }
  0x24   :  { %508 = dma.done.wait [#allocation3], 1024  }
  0x25   :  { %509 = vsyncadd [#allocation3], 4294966272 }
  0x26   :  { %510 = dma.done.wait [#allocation6], 1024  }
  0x27   :  { %511 = vsyncadd [#allocation6], 4294966272  ;;  %v520_v0 = vmov 0.0   ;;  %vm521_vm0 = vmmov 0   ;;  %v400_v1 = vld [vmem:[#allocation2] sm:$0xff]   ;;  %v401_v2 = vld [vmem:[#allocation2 + $0x8] sm:$0xff]  }
  0x28   :  { %352 = vmatprep.subr.bf16.mxu0 %v520_v0  ;;  %368 = vmatprep.mubr.msk.bf16.mxu0 %vm521_vm0, %v520_v0  ;;  %v402_v3 = vld [vmem:[#allocation2 + $0x10] sm:$0xff]   ;;  %v408_v4 = vld [vmem:[#allocation5] sm:$0xff]   ;;  %v403_v5 = vld [vmem:[#allocation2 + $0x18] sm:$0xff]  }
  0x29   :  { %372 = vmatprep.subr.bf16.mxu1 %v520_v0  ;;  %388 = vmatprep.mubr.msk.bf16.mxu1 %vm521_vm0, %v520_v0  ;;  %v409_v6 = vld [vmem:[#allocation5 + $0x8] sm:$0xff]   ;;  %v404_v7 = vld [vmem:[#allocation2 + $0x20] sm:$0xff]   ;;  %v410_v8 = vld [vmem:[#allocation5 + $0x10] sm:$0xff]  }
  0x2a   :  { %353 = vmatpush3.bf16.msra.mxu0 %v400_v1  ;;  %373 = vmatpush3.bf16.msra.mxu1 %v408_v4  ;;  %v405_v9 = vld [vmem:[#allocation2 + $0x28] sm:$0xff]   ;;  %v411_v10 = vld [vmem:[#allocation5 + $0x18] sm:$0xff]   ;;  %v406_v11 = vld [vmem:[#allocation2 + $0x30] sm:$0xff]  }
  0x2b   :  { %354 = vmatprep.subr.bf16.mxu0 %v520_v0  ;;  %374 = vmatprep.subr.bf16.mxu1 %v520_v0  ;;  %v412_v12 = vld [vmem:[#allocation5 + $0x20] sm:$0xff]   ;;  %v407_v13 = vld [vmem:[#allocation2 + $0x38] sm:$0xff]   ;;  %v413_v14 = vld [vmem:[#allocation5 + $0x28] sm:$0xff]  }
  0x2c   :  { %v53_v15 = vld [vmem:[%s616_s0] sm:$0xf]  ;;  %v414_v16 = vld [vmem:[#allocation5 + $0x30] sm:$0xff]   ;;  %v415_v17 = vld [vmem:[#allocation5 + $0x38] sm:$0xff]   ;;  %s522_s0 = smov [#allocation8]  }
  0x2d   :  { %v316_v18 = vld [vmem:[%s618_s2] ss:$0 sm:$0xff]  ;;  %s302_s25 = sshll.u32 %s522_s0, 4  ;;  %s303_s25 = int_to_ptr.vmem [resolvable:$true] %s302_s25 }
  0x2e   :  { %355 = vmatpush3.bf16.msra.mxu0 %v401_v2  ;;  %375 = vmatpush3.bf16.msra.mxu1 %v409_v6  ;;  %s464_s26 = scalar_lea.vmem %s303_s25, 64  ;;  %p469_p3 = scmp.lt.s32.totalorder %s303_s25, %s303_s25 }
  0x2f   :  { %356 = vmatprep.subr.bf16.mxu0 %v520_v0  ;;  %376 = vmatprep.subr.bf16.mxu1 %v520_v0  ;;  %p465_p2 = scmp.ne.s32.totalorder %s303_s25, %s464_s26  ;;  %p470_p4 = scmp.lt.s32.totalorder %s464_s26, %s464_s26 }
  0x31   :  { %p471_p5 = por %p470_p4, %p469_p3 }
  0x32   :  { %357 = vmatpush3.bf16.msra.mxu0 %v402_v3  ;;  %377 = vmatpush3.bf16.msra.mxu1 %v410_v8 }
  0x33   :  { %358 = vmatprep.subr.bf16.mxu0 %v520_v0  ;;  %378 = vmatprep.subr.bf16.mxu1 %v520_v0  ;;  %p472_p6 = pnand %p471_p5, %p465_p2 }
  0x36   :  { %359 = vmatpush3.bf16.msra.mxu0 %v403_v5  ;;  %379 = vmatpush3.bf16.msra.mxu1 %v411_v10 }
  0x37   :  { %360 = vmatprep.subr.bf16.mxu0 %v520_v0  ;;  %380 = vmatprep.subr.bf16.mxu1 %v520_v0 }
  0x3a   :  { %361 = vmatpush3.bf16.msra.mxu0 %v404_v7  ;;  %381 = vmatpush3.bf16.msra.mxu1 %v412_v12 }
  0x3b   :  { %362 = vmatprep.subr.bf16.mxu0 %v520_v0  ;;  %382 = vmatprep.subr.bf16.mxu1 %v520_v0 }
  0x3e   :  { %363 = vmatpush3.bf16.msra.mxu0 %v405_v9  ;;  %383 = vmatpush3.bf16.msra.mxu1 %v413_v14 }
  0x3f   :  { %364 = vmatprep.subr.bf16.mxu0 %v520_v0  ;;  %384 = vmatprep.subr.bf16.mxu1 %v520_v0 }
  0x42   :  { %365 = vmatpush3.bf16.msra.mxu0 %v406_v11  ;;  %385 = vmatpush3.bf16.msra.mxu1 %v414_v16 }
  0x43   :  { %366 = vmatprep.subr.bf16.mxu0 %v520_v0  ;;  %386 = vmatprep.subr.bf16.mxu1 %v520_v0 }
  0x46   :  { %367 = vmatpush3.bf16.msra.mxu0 %v407_v13  ;;  %387 = vmatpush3.bf16.msra.mxu1 %v415_v17 }
  0x49   :  { %369 = vmatmul.mubr.bf16.vlgmr.msra.gmra.mrb[0].mxu0 %v53_v15 }
 0x11c   :  { %v159_v19 = vpop.f32.mrb[0].mxu0 }
 0x11d   :  { %v160_v20 = vadd.f32 %v316_v18, %v159_v19  ;;  %v370_v21 = vpop.f32.mrb[1].mxu0 }
 0x11e   :  { %v162_v22 = vpop.f32.mrb[2].mxu0 }
 0x11f   :  { %v165_v23 = vmax.f32 %v160_v20, 0.0  ;;  %v371_v24 = vpop.f32.mrb[3].mxu0 }
 0x121   :  { %v166_v25 = vpack.c.bf16 %v165_v23, %v165_v23 }
 0x123   :  { %283 = vst [vmem:[#allocation8] sm:$0xf] %v166_v25  ;;  %389 = vmatmul.mubr.bf16.vlgmr.msra.gmra.mrb[0].mxu1 %v166_v25 }
 0x124   :  { %475 = shalt.err (!%p472_p6)
}
 0x125   :  { %s476_s28 = scalar_lea.hbm %s622_s6, 64 }
 0x126   :  { %p477_p7 = scmp.ne.s32.totalorder %s622_s6, %s476_s28  ;;  %p480_p8 = scmp.lt.u32.totalorder %s476_s28, %s622_s6 }
 0x128   :  { %p482_p9 = pnand %p480_p8, %p477_p7 }
 0x12a   :  { %485 = shalt.err (!%p482_p9)
}
 0x12b   :  { %305 = dma.vmem_to_hbm [thread:$0]  %s303_s25, 64, %s622_s6, [#allocation9]   ;;  %v325_v26 = vld [vmem:[%s620_s4] ss:$0 sm:$0xff] }
 0x12c   :  { %s523_s13 = smov [#allocation7]  }
 0x12d   :  { %s292_s14 = sshll.u32 %s523_s13, 4  ;;  %s293_s14 = int_to_ptr.vmem [resolvable:$true] %s292_s14 }
 0x12e   :  { %s486_s6 = scalar_lea.vmem %s293_s14, 64  ;;  %p491_p11 = scmp.lt.s32.totalorder %s293_s14, %s293_s14 }
 0x12f   :  { %p487_p10 = scmp.ne.s32.totalorder %s293_s14, %s486_s6  ;;  %p492_p12 = scmp.lt.s32.totalorder %s486_s6, %s486_s6 }
 0x131   :  { %p493_p13 = por %p492_p12, %p491_p11 }
 0x133   :  { %p494_p0 = pnand %p493_p13, %p487_p10 }
 0x1f6   :  { %v272_v27 = vpop.f32.mrb[0].mxu1 }
 0x1f7   :  { %v273_v28 = vadd.f32 %v325_v26, %v272_v27  ;;  %v390_v29 = vpop.f32.mrb[1].mxu1 }
 0x1f8   :  { %v275_v30 = vpop.f32.mrb[2].mxu1 }
 0x1f9   :  { %v278_v31 = vsub.f32 0.0, %v273_v28  ;;  %v391_v32 = vpop.f32.mrb[3].mxu1 }
 0x1fb   :  { %v279_v33 = vmul.f32 1.442695, %v278_v31 }
 0x1fd   :  { %416 = vpow2.f32 %v279_v33 }
 0x207   :  { %v417_v34 = vpop.eup %416 }
 0x208   :  { %v281_v35 = vadd.f32 1.0, %v417_v34 }
 0x20a   :  { %418 = vrcp.f32 %v281_v35 }
 0x214   :  { %v419_v36 = vpop.eup %418 }
 0x215   :  { %v284_v37 = vpack.c.bf16 %v419_v36, %v419_v36 }
 0x217   :  { %285 = vst [vmem:[#allocation7] sm:$0xf] %v284_v37 }
 0x218   :  { %497 = shalt.err (!%p494_p0)
}
 0x219   :  { %s498_s16 = scalar_lea.hbm %s621_s5, 64 }
 0x21a   :  { %p499_p1 = scmp.ne.s32.totalorder %s621_s5, %s498_s16  ;;  %p502_p2 = scmp.lt.u32.totalorder %s498_s16, %s621_s5 }
 0x21c   :  { %p504_p3 = pnand %p502_p2, %p499_p1 }
 0x21e   :  { %507 = shalt.err (!%p504_p3)
}
 0x21f   :  { %295 = dma.vmem_to_hbm [thread:$0]  %s293_s14, 64, %s621_s5, [#allocation4]  }
 0x220   :  { %512 = dma.done.wait [#allocation4], 64  }
 0x221   :  { %513 = vsyncadd [#allocation4], 4294967232 }
 0x222   :  { %514 = dma.done.wait [#allocation9], 64  }
 0x223   :  { %515 = vsyncadd [#allocation9], 4294967232 }
 0x224   :  { %312 = vsyncpa [#allocation3], 1 }
 0x225   :  { %313 = vsyncpa [#allocation6], 1 }
 0x226   :  { %314 = vsyncpa [#allocation4], 1 }
 0x227   :  { %315 = vsyncpa [#allocation9], 1 }

</bundles_post_ra>
